<compile_context>
chip_gen: v6e
topology: v6e:2x2x1
jax: 0.10.0
libtpu: 0.0.40
codegen_flags: <defaults>
</compile_context>

<pallas_src>
import math

import jax
import jax.numpy as jnp
from jax.experimental import pallas as pl
from jax.experimental.pallas import tpu as pltpu


def _embed_kernel(x_ref, w_ref, pe_ref, o_ref):
    # x_ref:  (TM, C)      TM = k*L rows (k whole sequences) of value inputs
    # w_ref:  (C, Dp)      value_embedding weight (transposed vs. torch), resident f32
    # pe_ref: (TM, Dp)     position embedding (+ folded Linear bias), resident f32
    # o_ref:  (TM, Dp)
    val = jnp.dot(x_ref[...].astype(jnp.float32), w_ref[...],
                  preferred_element_type=jnp.float32)          # MXU, f32 acc
    o_ref[...] = (val + pe_ref[...]).astype(o_ref.dtype)
    # TODO(synk): dropout omitted - identity at inference; training would need
    # pltpu.prng_seed / prng_random_bits masking.


def _round_up(a, m):
    return (a + m - 1) // m * m


def _pick_tm(N, L, C, D_pad, in_itemsize, out_itemsize, tm_max):
    """Rows per grid step: whole sequences, 8-aligned, VMEM-budgeted."""
    lcm = L * 8 // math.gcd(L, 8)          # smallest 8-aligned whole-sequence block

    def vmem_est(tm):                      # conservatively count double buffers
        x_t = _round_up(tm, 8) * _round_up(C, 128) * in_itemsize
        w_t = _round_up(C, 8) * D_pad * 4
        pe_t = _round_up(tm, 8) * D_pad * 4
        o_t = _round_up(tm, 8) * D_pad * out_itemsize
        return 2 * (x_t + w_t + pe_t + o_t)

    tm_cap = max(lcm, (tm_max // lcm) * lcm)
    half = _round_up(pl.cdiv(N, 2), lcm)   # keep >= 2 grid steps (v7x: 2 TCs)
    tm = min(tm_cap, max(lcm, half), _round_up(N, lcm))
    while tm > lcm and vmem_est(tm) > 48 * 2**20:
        tm -= lcm
    return tm, vmem_est(tm)


def data_embedding(x, w, b, pos_table, x_mark=None, *, tm_max=1024):
    """x: (B, L, C); w: (C, D); b: (D,); pos_table: (>=L, D). Returns (B, L, D).

    x_mark is accepted for API parity with the PyTorch module but is unused by
    its forward pass.
    """
    B, L, C = x.shape
    Cw, D = w.shape
    assert Cw == C, "weight in-features must match c_in"
    assert pos_table.shape[0] >= L, "position table has fewer rows than seq len"

    out_dtype = x.dtype
    D_pad = _round_up(D, 128)                   # lane-dense output stores

    # --- one-time parameter prep (tiny; independent of batch size) -----------
    pe = pos_table[:L].astype(jnp.float32) + b.astype(jnp.float32)[None, :]
    w_k = w.astype(jnp.float32)
    if D_pad != D:
        pe = jnp.pad(pe, ((0, 0), (0, D_pad - D)))
        w_k = jnp.pad(w_k, ((0, 0), (0, D_pad - D)))

    N = B * L
    x2 = x.reshape(N, C)                        # contiguous -> no data movement

    TM, vmem_bytes = _pick_tm(N, L, C, D_pad, x.dtype.itemsize,
                              jnp.dtype(out_dtype).itemsize, tm_max)
    k = TM // L
    # Position rows for ONE block (k whole sequences) -- resident, read once.
    pe_blk = jnp.tile(pe, (k, 1))               # (TM, D_pad), small

    grid = (pl.cdiv(N, TM),)                    # ragged last block is clipped

    cost = pl.CostEstimate(
        flops=2 * N * C * D_pad,
        transcendentals=0,
        bytes_accessed=(N * C * x.dtype.itemsize                 # read x
                        + C * D_pad * 4                          # read weight (once)
                        + TM * D_pad * 4                         # read pos block (once)
                        + N * D_pad * jnp.dtype(out_dtype).itemsize),  # write out
    )

    out = pl.pallas_call(
        _embed_kernel,
        out_shape=jax.ShapeDtypeStruct((N, D_pad), out_dtype),
        grid_spec=pltpu.PrefetchScalarGridSpec(
            num_scalar_prefetch=0,
            grid=grid,
            in_specs=[
                pl.BlockSpec((TM, C), lambda i: (i, 0)),
                pl.BlockSpec((C, D_pad), lambda i: (0, 0)),      # resident
                pl.BlockSpec((TM, D_pad), lambda i: (0, 0)),     # resident
            ],
            out_specs=pl.BlockSpec((TM, D_pad), lambda i: (i, 0)),
        ),
        compiler_params=pltpu.CompilerParams(
            dimension_semantics=("parallel",),
            vmem_limit_bytes=int(min(max(vmem_bytes + (4 << 20), 32 << 20),
                                     56 << 20)),
        ),
        cost_estimate=cost,
    )(x2, w_k, pe_blk)

    if D_pad != D:
        out = out[:, :D]
    return out.reshape(B, L, D)


if __name__ == "__main__":
    # Shapes consistent with the module: seq_len=12, pred_len=1 -> 13-row
    # position table; c_in=4 (3 features + target); d_model=512.
    # B=3 is deliberately not a multiple of the sequences-per-block so the
    # ragged-last-block clipping path is exercised.
    B = 3
    L = 12                 # x.size(1) == seq_len
    C_IN = 4               # c_in
    D_MODEL = 512          # d_model (multiple of 128 -> unmasked stores)
    POS_ROWS = 12 + 1      # CONFIG['seq_len'] + CONFIG['pred_len']

    key = jax.random.PRNGKey(0)
    k_x, k_xm, k_w, k_b, k_pos = jax.random.split(key, 5)

    x = jax.random.normal(k_x, (B, L, C_IN), dtype=jnp.float32)
    x_mark = jax.random.normal(k_xm, (B, L, C_IN), dtype=jnp.float32)  # unused (as in torch)

    # Deterministic parameter init (shapes match nn.Linear / nn.Embedding).
    w = jax.random.normal(k_w, (C_IN, D_MODEL), dtype=jnp.float32) * 0.1    # Linear weight^T
    b = jax.random.normal(k_b, (D_MODEL,), dtype=jnp.float32) * 0.1         # Linear bias
    pos_table = jax.random.normal(k_pos, (POS_ROWS, D_MODEL), dtype=jnp.float32) * 0.1

    out = data_embedding(x, w, b, pos_table, x_mark)
    out = jax.block_until_ready(out)

    # Reference check in plain JAX.
    ref = x @ w + b[None, None, :] + pos_table[:L][None, :, :]
    assert out.shape == (B, L, D_MODEL)
    assert out.dtype == x.dtype
    assert jnp.allclose(out, ref, atol=1e-5, rtol=1e-5)

    print("KERNEL_OK")
</pallas_src>

<mosaic_0001>
module attributes {stable_mosaic.version = 11 : i64} {
  func.func @_embed_kernel(%arg0: i32, %arg1: memref<24x4xf32, #tpu.memory_space<vmem>>, %arg2: memref<4x512xf32, #tpu.memory_space<vmem>>, %arg3: memref<24x512xf32, #tpu.memory_space<vmem>>, %arg4: memref<24x512xf32, #tpu.memory_space<vmem>>) attributes {dimension_semantics = [#tpu.dimension_semantics<parallel>], iteration_bounds = array<i64: 2>, scalar_prefetch = 0 : i64, scratch_operands = 0 : i64, tpu.core_type = #tpu.core_type<tc>, window_params = [{transform_indices = @transform_0, window_bounds = array<i64: 24, 4>}, {pipeline_mode = #tpu.pipeline_mode<synchronous>, transform_indices = @transform_1, window_bounds = array<i64: 4, 512>}, {pipeline_mode = #tpu.pipeline_mode<synchronous>, transform_indices = @transform_2, window_bounds = array<i64: 24, 512>}, {transform_indices = @transform_3, window_bounds = array<i64: 24, 512>}]} {
    %c0 = arith.constant 0 : index
    %c0_0 = arith.constant 0 : index
    %0 = vector.load %arg1[%c0, %c0_0] : memref<24x4xf32, #tpu.memory_space<vmem>>, vector<24x4xf32>
    %c0_1 = arith.constant 0 : index
    %c0_2 = arith.constant 0 : index
    %1 = vector.load %arg2[%c0_1, %c0_2] : memref<4x512xf32, #tpu.memory_space<vmem>>, vector<4x512xf32>
    %cst = arith.constant dense<0.000000e+00> : vector<24x512xf32>
    %2 = tpu.matmul %0, %1, %cst {dimension_numbers = #tpu.dot_dimension_numbers<[1], [0], [0], [1], [0, 0, 1, 1], [], []>} : vector<24x4xf32>, vector<4x512xf32>, vector<24x512xf32> -> vector<24x512xf32>
    %c0_3 = arith.constant 0 : index
    %c0_4 = arith.constant 0 : index
    %3 = vector.load %arg3[%c0_3, %c0_4] : memref<24x512xf32, #tpu.memory_space<vmem>>, vector<24x512xf32>
    %4 = arith.addf %2, %3 : vector<24x512xf32>
    %c0_5 = arith.constant 0 : index
    %c0_6 = arith.constant 0 : index
    %5 = vector.load %arg4[%c0_5, %c0_6] : memref<24x512xf32, #tpu.memory_space<vmem>>, vector<24x512xf32>
    tpu.vector_store %arg4[%c0_5, %c0_6], %4 {strides = array<i32>} : memref<24x512xf32, #tpu.memory_space<vmem>>, vector<24x512xf32>,
    return
  }
  func.func @transform_0(%arg0: i32) -> (i32, i32) {
    %c0_i32 = arith.constant 0 : i32
    %c0_i32_0 = arith.constant 0 : i32
    return %arg0, %c0_i32 : i32, i32
  }
  func.func @transform_1(%arg0: i32) -> (i32, i32) {
    %c0_i32 = arith.constant 0 : i32
    %c0_i32_0 = arith.constant 0 : i32
    %c0_i32_1 = arith.constant 0 : i32
    return %c0_i32, %c0_i32_0 : i32, i32
  }
  func.func @transform_2(%arg0: i32) -> (i32, i32) {
    %c0_i32 = arith.constant 0 : i32
    %c0_i32_0 = arith.constant 0 : i32
    %c0_i32_1 = arith.constant 0 : i32
    return %c0_i32, %c0_i32_0 : i32, i32
  }
  func.func @transform_3(%arg0: i32) -> (i32, i32) {
    %c0_i32 = arith.constant 0 : i32
    %c0_i32_0 = arith.constant 0 : i32
    return %arg0, %c0_i32 : i32, i32
  }
}

</mosaic_0001>

<bundles_post_ra>
// kernel: tpu_custom_call.1
= control target key start
LH: loop header
LB: loop body
LE: loop exit
PB: predicated region body
PF: predicated region fallthrough
CT: control target
= control target key end

     0   :  { %8 = vsyncpa [#allocation3], 0  ;;  %s897_s0 = inlined_call_operand.vmem [shape: f32[36,4], index: 0, kind: input, shape index: {}]   ;;  %s898_s1 = inlined_call_operand.vmem [shape: f32[4,512], index: 1, kind: input, shape index: {}]   ;;  %s899_s2 = inlined_call_operand.hbm [shape: f32[24,512], index: 2, kind: input, shape index: {}]   ;;  %s900_s3 = inlined_call_operand.hbm [shape: f32[36,512], index: 3, kind: output, shape index: {}]  }
   0x1   :  { %9 = vsyncpa [#allocation4], 0 }
   0x2   :  { %11 = vsyncpa [#allocation4 + $0x1], 0  ;;  %s732_s12 = smov 0   ;;  %s734_s13 = smov 0  }
   0x3   :  { %s736_s14 = smov 0   ;;  %s738_s15 = smov 0  }
   0x4 LB: > { %s753_s16 = sadd.s32 4294967295, %s703_s15   ;;  %s526_s17 = sadd.s32 4294967294, %s703_s15   ;;  %s703_s15 = sphi %s738_s15, %s908_s15   ;;  %s699_s14 = sphi %s736_s14, %s907_s14   ;;  %s695_s13 = sphi %s734_s13, %s906_s13   ;;  %s691_s12 = sphi %s732_s12, %s905_s12  }
   0x5   : > { %s757_s18 = sadd.s32 1, %s703_s15   ;;  %s92_s19 = sadd.s32 1, %s699_s14 }
   0x6   : > { %s89_s20 = ssub.s32 %s703_s15, %s757_s18  ;;  %p102_p0 = scmp.ne.s32.totalorder %s699_s14, %s695_s13 }
   0x7   : > { %p90_p1 = scmp.eq.s32.totalorder %s89_s20, 0  ;;  %p103_p2 = scmp.eq.s32.totalorder %s753_s16, 1 }
   0x8   : > { %p108_p3 = scmp.ne.s32.totalorder %s695_s13, %s691_s12  ;;  %p109_p4 = scmp.eq.s32.totalorder %s526_s17, 1 }
   0x9   : > { %s768_s21 = scalar_select %p90_p1, %s699_s14, %s92_s19  }
   0xa   : > { %p770_p5 = por %p103_p2, %p102_p0  ;;  %p774_p6 = por %p109_p4, %p108_p3 }
   0xb   : > { %p527_p7 = scmp.ge.s32.totalorder %s703_s15, 1  ;;  %p116_p8 = scmp.lt.s32.totalorder %s703_s15, 3 }
   0xc   : > { %s902_s23 = scalar_select %p774_p6, 1, 0 }
   0xd   : > { %p570_p9 = scmp.eq.s32.totalorder %s753_s16, 0  ;;  %p781_p10 = pnand %p527_p7, %p116_p8 }
   0xe   : > { %s705_s25 = smov [#allocation2]  }
   0xf   : > { %s131_s26 = sshll.u32 %s705_s25, 4  ;;  %p562_p11 = pneg %p781_p10  ;;  %s132_s26 = int_to_ptr.vmem [resolvable:$true] %s131_s26 }
  0x10   : > { %s624_s27 = scalar_lea.vmem %s132_s26, 1536  ;;  %p632_p3 = scmp.lt.s32.totalorder %s132_s26, %s132_s26 }
  0x11   : > { %p563_p12 = pnand %p570_p9, %p562_p11  ;;  %p625_p0 = scmp.ne.s32.totalorder %s132_s26, %s624_s27 }
  0x12   : > { %p633_p4 = scmp.lt.s32.totalorder %s624_s27, %s624_s27 }
  0x13   : > { %p615_p13 = pneg %p563_p12 }
  0x14   : > { %p634_p6 = por %p633_p4, %p632_p3 }
  0x15   : > { %p627_p1 = pnand %p625_p0, %p615_p13 }
  0x17   : > { %p628_p2 = pneg %p627_p1 }
  0x19   : > { %p635_p7 = pnand %p634_p6, %p628_p2 }
  0x1b   : > { %638 = shalt.err (!%p635_p7)
}
  0x1c   : > { %s706_s28 = smov 512   ;;  %s707_s29 = smov 32  }
  0x1d   : > { %565 = dma.hbm_to_vmem [thread:$0]  (!%p563_p12), %s899_s2, 1536, %s132_s26, [#allocation3], %s706_s28, %s706_s28, %s707_s29  }
  0x1e   : > { %164 = sbr.rel (%p781_p10) target bundleno = 278 (0x116), region = 32 }
  0x23   : > { %682 = dma.done.wait (%p570_p9), [#allocation3], 1536  }
  0x24   : > { %684 = vsyncadd (%p570_p9), [#allocation3], 4294965760  ;;  %s799_s5 = smul.u32 3, %s753_s16  ;;  %v708_v0 = vmov 0.0   ;;  %v215_v1 = vld [vmem:[%s898_s1] sm:$0xff]  ;;  %vm243_vm0 = vcmask 1043456  }
  0x25   : > { %316 = vmatprep.mubr.f32.mxu0 %v708_v0  ;;  %399 = vmatprep.mubr.f32.mxu1 %v708_v0  ;;  %v216_v2 = vld [vmem:[%s898_s1 + $0x8] sm:$0xff]  ;;  %v231_v3 = vcombine.high %v215_v1, %v215_v1  ;;  %vm233_vm1 = vcmask 31744   ;;  %s189_s24 = sand.u32 1, %s695_s13   ;;  %v217_v8 = vld [vmem:[#allocation2] sm:$0xff]  ;;  %v219_v9 = vld [vmem:[#allocation2 + $0x10] sm:$0xff] }
  0x26   : > { %p197_p6 = scmp.lt.s32.totalorder %s799_s5, 4  ;;  %v232_v4 = vcombine.high %v216_v2, %v216_v2  ;;  %s556_s25 = smul.u32 96, %s189_s24  ;;  %v218_v12 = vld [vmem:[#allocation2 + $0x8] sm:$0xff]  ;;  %v220_v13 = vld [vmem:[#allocation2 + $0x18] sm:$0xff]  ;;  %v221_v18 = vld [vmem:[#allocation2 + $0x20] sm:$0xff] }
  0x27   : > { %533 = vmatprep.subr.msk.mxu0 %vm243_vm0, %v231_v3  ;;  %v223_v19 = vld [vmem:[#allocation2 + $0x30] sm:$0xff]  ;;  %v222_v24 = vld [vmem:[#allocation2 + $0x28] sm:$0xff]  ;;  %v224_v25 = vld [vmem:[#allocation2 + $0x38] sm:$0xff]  ;;  %s837_s27 = scalar_lea.sflag [#allocation4], %s189_s24  ;;  %s439_s28 = ssub.s32 (%p770_p5), 5, %s799_s5 }
  0x28   : > { %s198_s6 = scalar_select %p197_p6, %s799_s5, 4  ;;  %538 = vmatprep.subr.msk.mxu1 %vm243_vm0, %v232_v4  ;;  %534 = vmatpush1.msk.msra.mxu0 %vm243_vm0, %v215_v1  ;;  %v225_v30 = vld [vmem:[#allocation2 + $0x40] sm:$0xff]  ;;  %v227_v31 = vld [vmem:[#allocation2 + $0x50] sm:$0xff]  ;;  %v226_v36 = vld [vmem:[#allocation2 + $0x48] sm:$0xff] }
  0x29   : > { %539 = vmatpush1.msk.msra.mxu1 %vm243_vm0, %v216_v2  ;;  %s821_s26 = scalar_lea.vmem [#allocation5], %s556_s25  ;;  %v228_v37 = vld [vmem:[#allocation2 + $0x58] sm:$0xff]  ;;  %p440_p8 = scmp.lt.s32.totalorder (%p770_p5), %s439_s28, 3 }
  0x2a   : > { %s532_s7 = sshll.u32 %s198_s6, 3 }
  0x2b   : > { %s200_s20 = scalar_lea.vmem %s897_s0, %s532_s7 }
  0x2c   : > { %v212_v5 = vld [vmem:[%s200_s20] sm:$0xff]  ;;  %v213_v6 = vld [vmem:[%s200_s20 + $0x8] sm:$0xff]  ;;  %v214_v7 = vld [vmem:[%s200_s20 + $0x10] sm:$0xff] }
  0x2d   : > { %535 = vmatmul.mubr.msk.f32.vlgmr.msra.gmra.mxu0 %vm233_vm1, %v212_v5  ;;  %540 = vmatmul.mubr.msk.f32.vlgmr.msra.gmra.mxu1 %vm233_vm1, %v212_v5 }
  0x2e   : > { %322 = vmatprep.mubr.f32.mxu0 %v708_v0  ;;  %405 = vmatprep.mubr.f32.mxu1 %v708_v0 }
  0x31   : > { %536 = vmatmul.mubr.msk.f32.gmra.mxu0 %vm233_vm1, %v213_v6  ;;  %541 = vmatmul.mubr.msk.f32.gmra.mxu1 %vm233_vm1, %v213_v6 }
  0x32   : > { %328 = vmatprep.mubr.f32.mxu0 %v708_v0  ;;  %411 = vmatprep.mubr.f32.mxu1 %v708_v0 }
  0x35   : > { %537 = vmatmul.mubr.msk.f32.gmra.mxu0 %vm233_vm1, %v214_v7  ;;  %542 = vmatmul.mubr.msk.f32.gmra.mxu1 %vm233_vm1, %v214_v7 }
  0xed   : > { %v318_v10 = vpop.f32.mrf.mxu0  ;;  %v401_v11 = vpop.f32.mrf.mxu1 }
  0xee   : > { %v319_v14 = vadd.f32 %v318_v10, %v217_v8  ;;  %v402_v15 = vadd.f32 %v401_v11, %v219_v9 }
  0xef   : > { %v320_v16 = vpop.f32.mrf.mxu0  ;;  %v403_v17 = vpop.f32.mrf.mxu1 }
  0xf0   : > { %418 = vst [vmem:[%s821_s26] sm:$0xff] %v319_v14  ;;  %420 = vst [vmem:[%s821_s26 + $0x10] sm:$0xff] %v402_v15  ;;  %v321_v20 = vadd.f32 %v320_v16, %v218_v12  ;;  %v404_v21 = vadd.f32 %v403_v17, %v220_v13 }
  0xf1   : > { %v324_v22 = vpop.f32.mrf.mxu0  ;;  %v407_v23 = vpop.f32.mrf.mxu1 }
  0xf2   : > { %419 = vst [vmem:[%s821_s26 + $0x8] sm:$0xff] %v321_v20  ;;  %421 = vst [vmem:[%s821_s26 + $0x18] sm:$0xff] %v404_v21  ;;  %v325_v26 = vadd.f32 %v324_v22, %v221_v18  ;;  %v408_v27 = vadd.f32 %v407_v23, %v223_v19 }
  0xf3   : > { %v326_v28 = vpop.f32.mrf.mxu0  ;;  %v409_v29 = vpop.f32.mrf.mxu1 }
  0xf4   : > { %422 = vst [vmem:[%s821_s26 + $0x20] sm:$0xff] %v325_v26  ;;  %424 = vst [vmem:[%s821_s26 + $0x30] sm:$0xff] %v408_v27  ;;  %v327_v32 = vadd.f32 %v326_v28, %v222_v24  ;;  %v410_v33 = vadd.f32 %v409_v29, %v224_v25 }
  0xf5   : > { %v330_v34 = vpop.f32.mrf.mxu0  ;;  %v413_v35 = vpop.f32.mrf.mxu1 }
  0xf6   : > { %423 = vst [vmem:[%s821_s26 + $0x28] sm:$0xff] %v327_v32  ;;  %425 = vst [vmem:[%s821_s26 + $0x38] sm:$0xff] %v410_v33  ;;  %v331_v38 = vadd.f32 %v330_v34, %v225_v30  ;;  %v414_v39 = vadd.f32 %v413_v35, %v227_v31  ;;  %437 = sbr.rel (!%p770_p5) target bundleno = 278 (0x116), region = 40 }
  0xf7   : > { %v332_v40 = vpop.f32.mrf.mxu0  ;;  %v415_v41 = vpop.f32.mrf.mxu1 }
  0xf8   : > { %426 = vst [vmem:[%s821_s26 + $0x40] sm:$0xff] %v331_v38  ;;  %428 = vst [vmem:[%s821_s26 + $0x50] sm:$0xff] %v414_v39  ;;  %v333_v42 = vadd.f32 %v332_v40, %v226_v36  ;;  %v416_v43 = vadd.f32 %v415_v41, %v228_v37 }
  0xfa   : > { %427 = vst [vmem:[%s821_s26 + $0x48] sm:$0xff] %v333_v42  ;;  %429 = vst [vmem:[%s821_s26 + $0x58] sm:$0xff] %v416_v43 }
  0xfb   : > { %s910_s28 = smov (!%p440_p8, %s439_s28), 3 }
  0xfc   : > { %s842_s29 = sshll.u32 %s910_s28, 9 }
  0xfd   : > { %s445_s30 = ssub.s32 1536, %s842_s29 }
  0xfe   : > { %446 = vsyncadd %s837_s27, %s445_s30  ;;  %p545_p9 = scmp.ne.s32.totalorder %s842_s29, 0  ;;  %s555_s4 = smul.u32 1536, %s753_s16 }
  0xff   : > { %s452_s6 = sshll.u32 %s821_s26, 4  ;;  %s709_s9 = smov [#allocation5]   ;;  %s854_s6 = int_to_ptr.vmem [resolvable:$true] %s452_s6 }
 0x100   : > { %s852_s8 = scalar_lea.hbm %s900_s3, %s555_s4  ;;  %s639_s5 = scalar_lea.vmem %s854_s6, %s842_s29 }
 0x101   : > { %p640_p5 = scmp.ne.s32.totalorder %s854_s6, %s639_s5  ;;  %s643_s10 = sshll.u32 %s709_s9, 4  ;;  %s644_s10 = int_to_ptr.vmem [resolvable:$false] %s643_s10 }
 0x102   : > { %s645_s16 = scalar_lea.vmem %s644_s10, 3072  ;;  %p646_p12 = scmp.lt.s32.totalorder %s854_s6, %s644_s10 }
 0x103   : > { %p641_p10 = pnand %p640_p5, %p545_p9  ;;  %p647_p13 = scmp.lt.s32.totalorder %s645_s16, %s639_s5 }
 0x105   : > { %p642_p11 = pneg %p641_p10  ;;  %p648_p0 = por %p647_p13, %p646_p12 }
 0x107   : > { %p649_p1 = pnand %p648_p0, %p642_p11 }
 0x109   : > { %652 = shalt.err (!%p649_p1)
}
 0x10a   : > { %s653_s11 = scalar_lea.hbm %s852_s8, %s842_s29  ;;  %s657_s20 = scalar_lea.hbm %s900_s3, 2560 }
 0x10b   : > { %p654_p2 = scmp.ne.s32.totalorder %s852_s8, %s653_s11  ;;  %p658_p7 = scmp.lt.s32.totalorder %s852_s8, %s900_s3 }
 0x10c   : > { %p659_p6 = scmp.lt.s32.totalorder %s657_s20, %s653_s11 }
 0x10d   : > { %p655_p3 = pnand %p654_p2, %p545_p9 }
 0x10e   : > { %p660_p8 = por %p659_p6, %p658_p7 }
 0x10f   : > { %p656_p4 = pneg %p655_p3 }
 0x111   : > { %p661_p5 = pnand %p660_p8, %p656_p4 }
 0x113   : > { %664 = shalt.err (!%p661_p5)
}
 0x114   : > { %s710_s26 = smov 512   ;;  %s711_s28 = smov 32  }
 0x115   : > { %458 = dma.vmem_to_hbm [thread:$0]  (%p545_p9), %s854_s6, %s842_s29, %s852_s8, %s837_s27, %s710_s26, %s710_s26, %s711_s28  }
 0x116 PF: > { %p572_p10 = scmp.ge.s32.totalorder %s703_s15, 2  ;;  %s467_s30 = sand.u32 1, %s691_s12  }
 0x117   : > { %p904_p11 = scmp.ne.s32.totalorder %s902_s23, 0  ;;  %s468_s4 = scalar_lea.sflag [#allocation4], %s467_s30 }
 0x119   : > { %p567_p12 = pnand %p572_p10, %p904_p11 }
 0x11b   : > { %p568_p13 = pneg %p567_p12 }
 0x11d   : > { %686 = dma.done.wait (%p568_p13), %s468_s4, 1536  }
 0x11e   : > { %688 = vsyncadd (%p568_p13), %s468_s4, 4294965760  ;;  %p14_p0 = scmp.ge.s32.totalorder %s757_s18, 4   ;;  %s905_s12 = smov %s695_s13 }
 0x11f   : > { %s906_s13 = smov %s699_s14  ;;  %s907_s14 = smov %s768_s21 }
 0x120   : > { %s908_s15 = smov %s757_s18  ;;  %16 = sbr.rel (!%p14_p0) target bundleno = 4 (0x4), region = 72 }
 0x125   :  { %473 = vsyncpa [#allocation3], 1 }
 0x126   :  { %475 = vsyncpa [#allocation3 + $0x1], 1 }
 0x127   :  { %476 = vsyncpa [#allocation4], 1 }
 0x128   :  { %478 = vsyncpa [#allocation4 + $0x1], 1 }

</bundles_post_ra>
